<compile_context>
chip_gen: v6e
topology: v6e:2x2x1
jax: 0.10.0
libtpu: 0.0.40
codegen_flags: <defaults>
</compile_context>

<pallas_src>
import functools
import math

import jax
import jax.numpy as jnp
from jax.experimental import pallas as pl
from jax.experimental.pallas import tpu as pltpu


_PARALLEL = pltpu.CompilerParams(dimension_semantics=("parallel",))


def _pick_tile_m(m, preferred=256):
    """Largest row tile <= preferred that evenly divides m (multiple of 8 when possible)."""
    if m <= preferred:
        return m
    t = preferred
    while t >= 8:
        if m % t == 0:
            return t
        t -= 8
    return m


# ----------------------------- Pallas kernels -----------------------------

def _linear_kernel(x_ref, w_ref, b_ref, o_ref):
    # o = x @ w + b   (bf16 MXU operands, f32 accumulation)
    x = x_ref[...].astype(jnp.bfloat16)
    o_ref[...] = (jnp.dot(x, w_ref[...], preferred_element_type=jnp.float32)
                  + b_ref[...]).astype(o_ref.dtype)


def _attn_block_kernel(q_ref, k_ref, v_ref, res_ref, wo_ref, bo_ref,
                       g_ref, be_ref, o_ref, *, n_heads, scale):
    # One batch element per grid step; all heads computed in-kernel.
    # attention -> out-projection -> + residual -> LayerNorm, written lane-dense as (L, D).
    L, D = q_ref.shape[1], q_ref.shape[2]
    S = k_ref.shape[1]
    hd = D // n_heads

    q = q_ref[0].astype(jnp.bfloat16).reshape(L, n_heads, hd)
    k = k_ref[0].astype(jnp.bfloat16).reshape(S, n_heads, hd)
    v = v_ref[0].astype(jnp.bfloat16).reshape(S, n_heads, hd)

    # scores for all heads, f32 accumulation
    s = jnp.einsum("lhd,shd->hls", q, k,
                   preferred_element_type=jnp.float32) * scale          # (H, L, S)
    m = jnp.max(s, axis=-1, keepdims=True)
    p = jnp.exp(s - m)
    p = p * pl.reciprocal(jnp.sum(p, axis=-1, keepdims=True), approx=True)

    o = jnp.einsum("hls,shd->lhd", p.astype(jnp.bfloat16), v,
                   preferred_element_type=jnp.float32)                  # (L, H, hd)
    attn = o.reshape(L, D)                                              # heads concat -> lane-dense

    proj = jnp.dot(attn.astype(jnp.bfloat16), wo_ref[...],
                   preferred_element_type=jnp.float32) + bo_ref[...]

    z = res_ref[0] + proj                                               # residual in f32
    mu = jnp.mean(z, axis=-1, keepdims=True)
    var = jnp.mean(jnp.square(z - mu), axis=-1, keepdims=True)
    zn = (z - mu) * jax.lax.rsqrt(var + 1e-5)
    o_ref[...] = ((zn * g_ref[...] + be_ref[...])[None]).astype(o_ref.dtype)


def _ffn_block_kernel(x_ref, w1_ref, b1_ref, w2_ref, b2_ref, g_ref, be_ref, o_ref):
    # relu(x @ w1 + b1) @ w2 + b2 -> + residual -> LayerNorm, one row tile per grid step.
    x = x_ref[...]
    h = jnp.dot(x.astype(jnp.bfloat16), w1_ref[...],
                preferred_element_type=jnp.float32) + b1_ref[...]
    h = jnp.maximum(h, 0.0)
    y = jnp.dot(h.astype(jnp.bfloat16), w2_ref[...],
                preferred_element_type=jnp.float32) + b2_ref[...]
    z = x + y
    mu = jnp.mean(z, axis=-1, keepdims=True)
    var = jnp.mean(jnp.square(z - mu), axis=-1, keepdims=True)
    zn = (z - mu) * jax.lax.rsqrt(var + 1e-5)
    o_ref[...] = (zn * g_ref[...] + be_ref[...]).astype(o_ref.dtype)


# ------------------------------ wrappers -----------------------------------

def pallas_linear(x, w_bf16, b):
    M, Din = x.shape
    Dout = w_bf16.shape[1]
    tm = _pick_tile_m(M)
    return pl.pallas_call(
        _linear_kernel,
        out_shape=jax.ShapeDtypeStruct((M, Dout), jnp.float32),
        grid=(M // tm,),
        in_specs=[pl.BlockSpec((tm, Din), lambda i: (i, 0)),
                  pl.BlockSpec((Din, Dout), lambda i: (0, 0)),   # VMEM-resident weight
                  pl.BlockSpec((1, Dout), lambda i: (0, 0))],
        out_specs=pl.BlockSpec((tm, Dout), lambda i: (i, 0)),
        compiler_params=_PARALLEL,
    )(x, w_bf16, b.reshape(1, Dout))


def pallas_attn_block(q, k, v, res, w_o_bf16, b_o, gamma, beta, n_heads):
    B, L, D = q.shape
    S = k.shape[1]
    scale = 1.0 / math.sqrt(D // n_heads)
    kern = functools.partial(_attn_block_kernel, n_heads=n_heads, scale=scale)
    return pl.pallas_call(
        kern,
        out_shape=jax.ShapeDtypeStruct((B, L, D), jnp.float32),
        grid=(B,),
        in_specs=[pl.BlockSpec((1, L, D), lambda b: (b, 0, 0)),
                  pl.BlockSpec((1, S, D), lambda b: (b, 0, 0)),
                  pl.BlockSpec((1, S, D), lambda b: (b, 0, 0)),
                  pl.BlockSpec((1, L, D), lambda b: (b, 0, 0)),
                  pl.BlockSpec((D, D), lambda b: (0, 0)),
                  pl.BlockSpec((1, D), lambda b: (0, 0)),
                  pl.BlockSpec((1, D), lambda b: (0, 0)),
                  pl.BlockSpec((1, D), lambda b: (0, 0))],
        out_specs=pl.BlockSpec((1, L, D), lambda b: (b, 0, 0)),
        compiler_params=_PARALLEL,
    )(q, k, v, res, w_o_bf16, b_o.reshape(1, D), gamma.reshape(1, D), beta.reshape(1, D))


def pallas_ffn_block(x, w1_bf16, b1, w2_bf16, b2, gamma, beta):
    M, D = x.shape
    F = w1_bf16.shape[1]
    tm = _pick_tile_m(M)
    # TODO(synk): for large D/F (e.g. 1024/4096) tile the F dimension with a VMEM f32
    # accumulator so resident bf16 weights + hidden tile fit v7x's 64 MiB VMEM budget.
    return pl.pallas_call(
        _ffn_block_kernel,
        out_shape=jax.ShapeDtypeStruct((M, D), jnp.float32),
        grid=(M // tm,),
        in_specs=[pl.BlockSpec((tm, D), lambda i: (i, 0)),
                  pl.BlockSpec((D, F), lambda i: (0, 0)),        # VMEM-resident weights
                  pl.BlockSpec((1, F), lambda i: (0, 0)),
                  pl.BlockSpec((F, D), lambda i: (0, 0)),
                  pl.BlockSpec((1, D), lambda i: (0, 0)),
                  pl.BlockSpec((1, D), lambda i: (0, 0)),
                  pl.BlockSpec((1, D), lambda i: (0, 0))],
        out_specs=pl.BlockSpec((tm, D), lambda i: (i, 0)),
        compiler_params=_PARALLEL,
    )(x, w1_bf16, b1.reshape(1, F), w2_bf16, b2.reshape(1, D),
      gamma.reshape(1, D), beta.reshape(1, D))


# ------------------------- decoder layer forward ---------------------------

def transformer_decoder_layer(tgt, src, params, n_heads):
    B, L, D = tgt.shape
    S = src.shape[1]

    # 1) self-attention: fused QKV projection, then fused attn+out-proj+add&norm (norm2)
    sa = params["self_attn"]
    w_qkv = jnp.concatenate([sa["w_q"], sa["w_k"], sa["w_v"]], axis=1).astype(jnp.bfloat16)
    b_qkv = jnp.concatenate([sa["b_q"], sa["b_k"], sa["b_v"]], axis=0)
    qkv = pallas_linear(tgt.reshape(B * L, D), w_qkv, b_qkv)            # (B*L, 3D)
    q = qkv[:, :D].reshape(B, L, D)
    k = qkv[:, D:2 * D].reshape(B, L, D)
    v = qkv[:, 2 * D:].reshape(B, L, D)
    tgt = pallas_attn_block(q, k, v, tgt, sa["w_o"].astype(jnp.bfloat16), sa["b_o"],
                            params["norm2"]["g"], params["norm2"]["b"], n_heads)

    # 2) cross-attention: Q from tgt, fused KV from src, then fused attn+out-proj+add&norm (norm1)
    ca = params["cross_attn"]
    w_kv = jnp.concatenate([ca["w_k"], ca["w_v"]], axis=1).astype(jnp.bfloat16)
    b_kv = jnp.concatenate([ca["b_k"], ca["b_v"]], axis=0)
    q = pallas_linear(tgt.reshape(B * L, D),
                      ca["w_q"].astype(jnp.bfloat16), ca["b_q"]).reshape(B, L, D)
    kv = pallas_linear(src.reshape(B * S, D), w_kv, b_kv)               # (B*S, 2D)
    k = kv[:, :D].reshape(B, S, D)
    v = kv[:, D:].reshape(B, S, D)
    tgt = pallas_attn_block(q, k, v, tgt, ca["w_o"].astype(jnp.bfloat16), ca["b_o"],
                            params["norm1"]["g"], params["norm1"]["b"], n_heads)

    # 3) FFN + residual + norm3 (single fused kernel)
    f = params["ffn"]
    tgt = pallas_ffn_block(tgt.reshape(B * L, D),
                           f["w1"].astype(jnp.bfloat16), f["b1"],
                           f["w2"].astype(jnp.bfloat16), f["b2"],
                           params["norm3"]["g"], params["norm3"]["b"]).reshape(B, L, D)
    return tgt


# ----------------------------- pure-JAX reference ---------------------------

def _ref_mha(q_in, k_in, v_in, p, n_heads):
    B, Lq, D = q_in.shape
    Lk = k_in.shape[1]
    hd = D // n_heads
    scale = 1.0 / math.sqrt(hd)
    q = q_in @ p["w_q"] + p["b_q"]
    k = k_in @ p["w_k"] + p["b_k"]
    v = v_in @ p["w_v"] + p["b_v"]
    q = q.reshape(B, Lq, n_heads, hd).transpose(0, 2, 1, 3)
    k = k.reshape(B, Lk, n_heads, hd).transpose(0, 2, 1, 3)
    v = v.reshape(B, Lk, n_heads, hd).transpose(0, 2, 1, 3)
    s = jnp.einsum("bhqd,bhkd->bhqk", q, k) * scale
    p_attn = jax.nn.softmax(s, axis=-1)
    o = jnp.einsum("bhqk,bhkd->bhqd", p_attn, v)
    o = o.transpose(0, 2, 1, 3).reshape(B, Lq, D)
    return o @ p["w_o"] + p["b_o"]


def _ref_ln(x, g, b):
    mu = jnp.mean(x, axis=-1, keepdims=True)
    var = jnp.mean(jnp.square(x - mu), axis=-1, keepdims=True)
    return (x - mu) * jax.lax.rsqrt(var + 1e-5) * g + b


def _ref_layer(tgt, src, params, n_heads):
    tgt = _ref_ln(tgt + _ref_mha(tgt, tgt, tgt, params["self_attn"], n_heads),
                  params["norm2"]["g"], params["norm2"]["b"])
    tgt = _ref_ln(tgt + _ref_mha(tgt, src, src, params["cross_attn"], n_heads),
                  params["norm1"]["g"], params["norm1"]["b"])
    h = jnp.maximum(tgt @ params["ffn"]["w1"] + params["ffn"]["b1"], 0.0)
    tgt2 = h @ params["ffn"]["w2"] + params["ffn"]["b2"]
    return _ref_ln(tgt + tgt2, params["norm3"]["g"], params["norm3"]["b"])


# ------------------------------ parameter init ------------------------------

def init_params(key, d_model, d_ffn):
    ks = jax.random.split(key, 20)

    def w(k, shape):
        return jax.random.normal(k, shape, jnp.float32) * 0.02

    def attn_params(k0, k1, k2, k3):
        return {
            "w_q": w(k0, (d_model, d_model)), "b_q": jnp.zeros((d_model,), jnp.float32),
            "w_k": w(k1, (d_model, d_model)), "b_k": jnp.zeros((d_model,), jnp.float32),
            "w_v": w(k2, (d_model, d_model)), "b_v": jnp.zeros((d_model,), jnp.float32),
            "w_o": w(k3, (d_model, d_model)), "b_o": jnp.zeros((d_model,), jnp.float32),
        }

    return {
        "self_attn": attn_params(ks[0], ks[1], ks[2], ks[3]),
        "cross_attn": attn_params(ks[4], ks[5], ks[6], ks[7]),
        "norm1": {"g": jnp.ones((d_model,), jnp.float32), "b": jnp.zeros((d_model,), jnp.float32)},
        "norm2": {"g": jnp.ones((d_model,), jnp.float32), "b": jnp.zeros((d_model,), jnp.float32)},
        "norm3": {"g": jnp.ones((d_model,), jnp.float32), "b": jnp.zeros((d_model,), jnp.float32)},
        "ffn": {
            "w1": w(ks[8], (d_model, d_ffn)), "b1": jnp.zeros((d_ffn,), jnp.float32),
            "w2": w(ks[9], (d_ffn, d_model)), "b2": jnp.zeros((d_model,), jnp.float32),
        },
    }


# ----------------------------------- main -----------------------------------

if __name__ == "__main__":
    B, L, S = 2, 8, 16          # batch, num target queries, src sequence length
    D, FFN, H = 32, 64, 4       # d_model, d_ffn, n_heads (d_model % n_heads == 0)

    key = jax.random.PRNGKey(0)
    k_tgt, k_src, k_par = jax.random.split(key, 3)
    tgt = jax.random.normal(k_tgt, (B, L, D), jnp.float32)
    src = jax.random.normal(k_src, (B, S, D), jnp.float32)
    params = init_params(k_par, D, FFN)

    out = transformer_decoder_layer(tgt, src, params, H)
    out = jax.block_until_ready(out)

    ref = _ref_layer(tgt, src, params, H)
    assert out.shape == (B, L, D)
    assert jnp.allclose(out, ref, rtol=2e-2, atol=2e-2), "mismatch vs reference"

    print("KERNEL_OK")
</pallas_src>

<mosaic_0001>
module attributes {stable_mosaic.version = 11 : i64} {
  func.func @_linear_kernel(%arg0: i32, %arg1: memref<16x32xf32, #tpu.memory_space<vmem>>, %arg2: memref<32x96xbf16, #tpu.memory_space<vmem>>, %arg3: memref<1x96xf32, #tpu.memory_space<vmem>>, %arg4: memref<16x96xf32, #tpu.memory_space<vmem>>) attributes {dimension_semantics = [#tpu.dimension_semantics<parallel>], iteration_bounds = array<i64: 1>, scalar_prefetch = 0 : i64, scratch_operands = 0 : i64, tpu.core_type = #tpu.core_type<tc>, window_params = [{transform_indices = @transform_0, window_bounds = array<i64: 16, 32>}, {pipeline_mode = #tpu.pipeline_mode<synchronous>, transform_indices = @transform_1, window_bounds = array<i64: 32, 96>}, {pipeline_mode = #tpu.pipeline_mode<synchronous>, transform_indices = @transform_2, window_bounds = array<i64: 1, 96>}, {transform_indices = @transform_3, window_bounds = array<i64: 16, 96>}]} {
    %c0 = arith.constant 0 : index
    %c0_0 = arith.constant 0 : index
    %0 = vector.load %arg1[%c0, %c0_0] : memref<16x32xf32, #tpu.memory_space<vmem>>, vector<16x32xf32>
    %1 = arith.truncf %0 : vector<16x32xf32> to vector<16x32xbf16>
    %c0_1 = arith.constant 0 : index
    %c0_2 = arith.constant 0 : index
    %2 = vector.load %arg2[%c0_1, %c0_2] : memref<32x96xbf16, #tpu.memory_space<vmem>>, vector<32x96xbf16>
    %cst = arith.constant dense<0.000000e+00> : vector<16x96xf32>
    %3 = tpu.matmul %1, %2, %cst {dimension_numbers = #tpu.dot_dimension_numbers<[1], [0], [0], [1], [0, 0, 1, 1], [], []>} : vector<16x32xbf16>, vector<32x96xbf16>, vector<16x96xf32> -> vector<16x96xf32>
    %c0_3 = arith.constant 0 : index
    %c0_4 = arith.constant 0 : index
    %4 = vector.load %arg3[%c0_3, %c0_4] : memref<1x96xf32, #tpu.memory_space<vmem>>, vector<1x96xf32>
    %5 = vector.broadcast %4 : vector<1x96xf32> to vector<16x96xf32>
    %6 = arith.addf %3, %5 : vector<16x96xf32>
    %c0_5 = arith.constant 0 : index
    %c0_6 = arith.constant 0 : index
    %7 = vector.load %arg4[%c0_5, %c0_6] : memref<16x96xf32, #tpu.memory_space<vmem>>, vector<16x96xf32>
    tpu.vector_store %arg4[%c0_5, %c0_6], %6 {strides = array<i32>} : memref<16x96xf32, #tpu.memory_space<vmem>>, vector<16x96xf32>,
    return
  }
  func.func @transform_0(%arg0: i32) -> (i32, i32) {
    %c0_i32 = arith.constant 0 : i32
    %c0_i32_0 = arith.constant 0 : i32
    return %arg0, %c0_i32 : i32, i32
  }
  func.func @transform_1(%arg0: i32) -> (i32, i32) {
    %c0_i32 = arith.constant 0 : i32
    %c0_i32_0 = arith.constant 0 : i32
    %c0_i32_1 = arith.constant 0 : i32
    return %c0_i32, %c0_i32_0 : i32, i32
  }
  func.func @transform_2(%arg0: i32) -> (i32, i32) {
    %c0_i32 = arith.constant 0 : i32
    %c0_i32_0 = arith.constant 0 : i32
    %c0_i32_1 = arith.constant 0 : i32
    return %c0_i32, %c0_i32_0 : i32, i32
  }
  func.func @transform_3(%arg0: i32) -> (i32, i32) {
    %c0_i32 = arith.constant 0 : i32
    %c0_i32_0 = arith.constant 0 : i32
    return %arg0, %c0_i32 : i32, i32
  }
}

</mosaic_0001>

<bundles_post_ra>
// kernel: tpu_custom_call.1
= control target key start
LH: loop header
LB: loop body
LE: loop exit
PB: predicated region body
PF: predicated region fallthrough
CT: control target
= control target key end

     0   :  { %8 = vsyncpa [#allocation3], 0  ;;  %s275_s0 = inlined_call_operand.hbm [shape: f32[16,32], index: 0, kind: input, shape index: {}]   ;;  %s276_s1 = inlined_call_operand.hbm [shape: bf16[32,96], index: 1, kind: input, shape index: {}]   ;;  %s277_s2 = inlined_call_operand.vmem [shape: f32[1,96], index: 2, kind: input, shape index: {}]   ;;  %s278_s3 = inlined_call_operand.hbm [shape: f32[16,96], index: 3, kind: output, shape index: {}]  }
   0x1   :  { %9 = vsyncpa [#allocation6], 0 }
   0x2   :  { %10 = vsyncpa [#allocation4], 0  ;;  %s228_s12 = smov [#allocation2]  }
   0x3   :  { %s16_s13 = sshll.u32 %s228_s12, 4  ;;  %s17_s13 = int_to_ptr.vmem [resolvable:$true] %s16_s13 }
   0x4   :  { %s170_s14 = scalar_lea.vmem %s17_s13, 256  ;;  %p175_p1 = scmp.lt.s32.totalorder %s17_s13, %s17_s13 }
   0x5   :  { %p171_p0 = scmp.ne.s32.totalorder %s17_s13, %s170_s14  ;;  %p176_p2 = scmp.lt.s32.totalorder %s170_s14, %s170_s14 }
   0x7   :  { %p177_p3 = por %p176_p2, %p175_p1 }
   0x9   :  { %p178_p4 = pnand %p177_p3, %p171_p0 }
   0xb   :  { %181 = shalt.err (!%p178_p4)
}
   0xc   :  { %s229_s15 = smov 128   ;;  %s230_s16 = smov 8  }
   0xd   :  { %22 = dma.hbm_to_vmem [thread:$0]  %s275_s0, 256, %s17_s13, [#allocation3], %s229_s15, %s229_s15, %s230_s16  }
   0xe   :  { %s231_s19 = smov [#allocation5]  }
   0xf   :  { %s28_s20 = sshll.u32 %s231_s19, 4  ;;  %s29_s20 = int_to_ptr.vmem [resolvable:$true] %s28_s20 }
  0x10   :  { %s190_s21 = scalar_lea.vmem %s29_s20, 256  ;;  %p195_p6 = scmp.lt.s32.totalorder %s29_s20, %s29_s20 }
  0x11   :  { %p191_p5 = scmp.ne.s32.totalorder %s29_s20, %s190_s21  ;;  %p196_p7 = scmp.lt.s32.totalorder %s190_s21, %s190_s21 }
  0x13   :  { %p197_p8 = por %p196_p7, %p195_p6 }
  0x15   :  { %p198_p9 = pnand %p197_p8, %p191_p5 }
  0x17   :  { %201 = shalt.err (!%p198_p9)
}
  0x18   :  { %s232_s22 = smov 64   ;;  %s233_s23 = smov 4  }
  0x19   :  { %34 = dma.hbm_to_vmem [thread:$0]  %s276_s1, 256, %s29_s20, [#allocation6], %s232_s22, %s232_s22, %s233_s23  }
  0x1a   :  { %222 = dma.done.wait [#allocation3], 256  }
  0x1b   :  { %223 = vsyncadd [#allocation3], 4294967040 }
  0x1c   :  { %224 = dma.done.wait [#allocation6], 256  }
  0x1d   :  { %225 = vsyncadd [#allocation6], 4294967040  ;;  %v234_v0 = vmov 0.0   ;;  %vm235_vm0 = vmmov 0   ;;  %v160_v1 = vld [vmem:[#allocation5 + $0x8] sm:$0xff]   ;;  %v161_v2 = vld [vmem:[#allocation5] sm:$0xff]  }
  0x1e   :  { %143 = vmatprep.subr.bf16.mxu0 %v234_v0  ;;  %147 = vmatprep.mubr.msk.bf16.mxu0 %vm235_vm0, %v234_v0  ;;  %v44_v3 = vld [vmem:[#allocation2] sm:$0xff]  ;;  %v45_v4 = vld [vmem:[#allocation2 + $0x8] sm:$0xff]  ;;  %vm70_vm1 = vcmask 261120   ;;  %vm115_vm2 = vcmask 785408   ;;  %s236_s26 = smov [#allocation7]  }
  0x1f   :  { %144 = vmatpush3.bf16.msra.mxu0 %v160_v1  ;;  %v46_v5 = vpack.c.bf16 %v45_v4, %v44_v3  ;;  %v136_v6 = vld [vmem:[%s277_s2] ss:$0 sm:$0xff]  ;;  %s123_s27 = sshll.u32 %s236_s26, 4  ;;  %s124_s27 = int_to_ptr.vmem [resolvable:$true] %s123_s27 }
  0x20   :  { %145 = vmatprep.subr.bf16.mxu0 %v234_v0  ;;  %s202_s28 = scalar_lea.vmem %s124_s27, 256  ;;  %p207_p11 = scmp.lt.s32.totalorder %s124_s27, %s124_s27 }
  0x21   :  { %p203_p10 = scmp.ne.s32.totalorder %s124_s27, %s202_s28  ;;  %p208_p12 = scmp.lt.s32.totalorder %s202_s28, %s202_s28 }
  0x23   :  { %146 = vmatpush3.bf16.msra.mxu0 %v161_v2  ;;  %p209_p13 = por %p208_p12, %p207_p11 }
  0x25   :  { %p210_p0 = pnand %p209_p13, %p203_p10 }
  0x26   :  { %148 = vmatmul.mubr.msk.bf16.vlgmr.msra.gmra.mxu0 %vm70_vm1, %v46_v5 }
  0xe6   :  { %v108_v7 = vpop.f32.mrf.mxu0 }
  0xe7   :  { %v109_v8 = vadd.f32 %v136_v6, %v108_v7 }
  0xe8   :  { %v149_v9 = vpop.f32.mrf.mxu0 }
  0xe9   :  { %116 = vst.msk [vmem:[#allocation7] sm:$0xff] %vm115_vm2, %v109_v8 }
  0xea   :  { %v111_v10 = vpop.f32.mrf.mxu0 }
  0xeb   :  { %v112_v11 = vadd.f32 %v136_v6, %v111_v10 }
  0xec   :  { %v150_v12 = vpop.f32.mrf.mxu0 }
  0xed   :  { %117 = vst.msk [vmem:[#allocation7 + $0x8] sm:$0xff] %vm115_vm2, %v112_v11 }
  0xee   :  { %213 = shalt.err (!%p210_p0)
}
  0xef   :  { %129 = dma.vmem_to_hbm [thread:$0]  %s124_s27, 256, %s278_s3, [#allocation4], %s229_s15, %s229_s15, %s230_s16  }
  0xf0   :  { %226 = dma.done.wait [#allocation4], 256  }
  0xf1   :  { %227 = vsyncadd [#allocation4], 4294967040 }
  0xf2   :  { %133 = vsyncpa [#allocation3], 1 }
  0xf3   :  { %134 = vsyncpa [#allocation6], 1 }
  0xf4   :  { %135 = vsyncpa [#allocation4], 1 }

</bundles_post_ra>
